<compile_context>
chip_gen: v7x
topology: tpu7x:2x2x1
jax: 0.10.0
libtpu: 0.0.40
codegen_flags: <defaults>
</compile_context>

<pallas_src>
import functools

import jax
import jax.numpy as jnp
from jax.experimental import pallas as pl
from jax.experimental.pallas import tpu as pltpu


def attention_kernel(dec_ref, enc_ref, bias_ref, w1t_ref, vt_ref, out_ref, *,
                     seq_len, tanh_dtype):
    # dec_ref  : (BT, 1, H)    f32   hoisted decoder transform (dec @ W2^T)
    # enc_ref  : (BT*L, H)     f32   flattened encoder outputs (cast in-kernel)
    # bias_ref : (BT, Lp)      f32   log(mask+1e-40), lane-padded with -1e30
    # w1t_ref  : (H, H)        bf16  W1^T (grid-invariant)
    # vt_ref   : (1, 1, H)     f32
    # out_ref  : (BT, Lp)      f32
    bt, lp = bias_ref.shape
    h_out = w1t_ref.shape[1]
    l = seq_len

    # Cast the f32 encoder block to bf16 right before the MXU matmul (encoder
    # stream stays f32 in HBM; no separate wrapper-side cast pass).
    enc_bf16 = enc_ref[...].astype(jnp.bfloat16)                    # (BT*L, H)
    enc_tr = jnp.dot(enc_bf16, w1t_ref[...],
                     preferred_element_type=jnp.float32)            # (BT*L, H) f32

    # Free when L % 8 == 0 (sublane-aligned split); otherwise Mosaic retiles.
    # For L % 8 != 0 workloads, pad L upstream to a multiple of 8.
    x = enc_tr.reshape(bt, l, h_out) + dec_ref[...]                 # (BT, L, H) f32
    # tanh on the EUP; bf16 input on v6e/v7x (2x EUP throughput), f32 on v5e.
    hh = jnp.tanh(x.astype(tanh_dtype))
    # vt contraction as VPU multiply + XLU lane-reduce (keeps MXU free); the
    # f32 vt promotes the product to f32 regardless of tanh dtype.
    scores = jnp.sum(hh * vt_ref[...], axis=-1)                     # (BT, L) f32

    if lp == l:
        s = scores + bias_ref[...]
    else:
        # Stage a lane-dense (BT, Lp) score slab through the output block:
        # padded lanes carry the wrapper's finite -1e30 bias (exp() == 0),
        # real lanes get scores + log(mask + 1e-40).
        out_ref[...] = bias_ref[...]
        out_ref[:, :l] = bias_ref[:, :l] + scores
        s = out_ref[...]

    # Masked log-softmax over the lane-dense slab (identical to the original
    # module on the first L lanes; padded lanes contribute exp(-1e30) == 0).
    m = jnp.max(s, axis=-1, keepdims=True)
    shifted = s - m
    lse = jnp.log(jnp.sum(jnp.exp(shifted), axis=-1, keepdims=True))
    out_ref[...] = shifted - lse


def _tpu_params():
    """(vmem_capacity_bytes, is_multi_tensorcore, use_bf16_tanh)."""
    kind = ""
    try:
        kind = jax.devices()[0].device_kind.lower()
    except Exception:
        pass
    vmem = None
    try:
        vmem = int(pltpu.get_tpu_info().vmem_capacity_bytes)
    except Exception:
        vmem = None
    is_v7 = ("v7" in kind) or ("tpu7" in kind)
    if vmem is None or vmem <= 0:
        vmem = (64 << 20) if is_v7 else (128 << 20)
    # bf16 EUP exists on v6e (Trillium) and v7x; keep f32 tanh on v5e/unknown.
    use_bf16_tanh = is_v7 or ("v6" in kind) or ("trillium" in kind)
    return vmem, is_v7, use_bf16_tanh


def _choose_block_b(batch, seq, hidden, lane_seq, vmem_limit_bytes,
                    prefer_even_grid):
    """VMEM-aware batch-block size.

    Per batch row one grid step holds roughly:
      f32 enc input (double-buffered) 8B + in-kernel bf16 copy 2B +
      f32 enc_tr 4B + tanh/hh intermediate 4B   (all x seq*hidden)
      bias + out blocks (double-buffered)       (x lane_seq, 16B)
      dec block (double-buffered)               (x hidden, 8B)
    """
    per_row = seq * hidden * 18 + lane_seq * 16 + hidden * 8
    fixed = hidden * hidden * 4 + (2 << 20)            # W1^T buffers + slack
    usable = int(vmem_limit_bytes * 0.85) - fixed
    max_rows = max(1, usable // per_row) if usable > 0 else 1
    max_rows = int(min(max_rows, 1024))

    if batch <= max(8, min(max_rows, 16)):
        return int(batch)               # tiny batch: one step, block == full dim

    cap = int(min(max_rows, batch))
    cap8 = (cap // 8) * 8
    if cap8 < 8:
        return int(min(8, batch))       # VMEM-tight floor (smallest legal tile)

    best_score, best_b = None, 8
    for b in range(cap8, 7, -8):
        n_blocks = -(-batch // b)
        multi = n_blocks >= 2                           # overlap DMA / compute
        divides = (batch % b == 0) and (b * 2 > cap8)   # no ragged last block
        even = (n_blocks % 2 == 0) if prefer_even_grid else True
        score = (multi, divides, even, b)
        if best_score is None or score > best_score:
            best_score, best_b = score, b
    return int(best_b)


def attention_forward(decoder_state, encoder_outputs, mask, w1, w2, vt,
                      *, block_b=None):
    """w1, w2: (H, H) PyTorch-style Linear weights (out, in). vt: (1, H)."""
    B, L, H = encoder_outputs.shape
    vmem_cap, is_multi_tc, use_bf16_tanh = _tpu_params()
    vmem_limit = int(vmem_cap * 0.75)

    # Lane-dense score width (padded lanes carry a finite -1e30 bias).
    Lp = ((L + 127) // 128) * 128

    # ---- hoisted / precomputed work (tiny next to the encoder stream) ----
    dec_tr = jnp.dot(decoder_state, w2.T).astype(jnp.float32)[:, None, :]  # (B,1,H)
    bias = jnp.log(mask.astype(jnp.float32) + 1e-40)                       # (B,L)
    if Lp != L:
        bias = jnp.pad(bias, ((0, 0), (0, Lp - L)), constant_values=-1e30)
    enc_flat = encoder_outputs.reshape(B * L, H)    # free view; stays f32 in HBM
    w1t = w1.T.astype(jnp.bfloat16)                 # (H,H), tiny one-off cast
    vt3 = vt.reshape(1, 1, H).astype(jnp.float32)   # (1,1,H)
    # NOTE: for real workloads keep H a multiple of 128 (MXU / lane density);
    # the demo H is intentionally tiny.

    if block_b is None:
        block_b = _choose_block_b(B, L, H, Lp, vmem_limit, is_multi_tc)
    block_b = int(min(block_b, B))
    num_blocks = pl.cdiv(B, block_b)

    kernel = functools.partial(
        attention_kernel,
        seq_len=L,
        tanh_dtype=jnp.bfloat16 if use_bf16_tanh else jnp.float32,
    )

    out = pl.pallas_call(
        kernel,
        out_shape=jax.ShapeDtypeStruct((B, Lp), jnp.float32),
        grid=(num_blocks,),
        in_specs=[
            pl.BlockSpec((block_b, 1, H), lambda b: (b, 0, 0)),      # dec_tr
            pl.BlockSpec((block_b * L, H), lambda b: (b, 0)),        # enc (f32)
            pl.BlockSpec((block_b, Lp), lambda b: (b, 0)),           # mask bias
            pl.BlockSpec((H, H), lambda b: (0, 0)),                  # W1^T (bf16)
            pl.BlockSpec((1, 1, H), lambda b: (0, 0, 0)),            # vt
        ],
        out_specs=pl.BlockSpec((block_b, Lp), lambda b: (b, 0)),
        compiler_params=pltpu.CompilerParams(
            dimension_semantics=("parallel",),
            vmem_limit_bytes=vmem_limit,
        ),
    )(dec_tr, enc_flat, bias, w1t, vt3)

    return out[:, :L]


def attention_reference(decoder_state, encoder_outputs, mask, w1, w2, vt):
    enc_tr = jnp.einsum("blh,oh->blo", encoder_outputs, w1)
    dec_tr = jnp.einsum("bh,oh->bo", decoder_state, w2)[:, None, :]
    u = jnp.einsum("blh,oh->blo", jnp.tanh(enc_tr + dec_tr), vt)[..., 0]
    u = u + jnp.log(mask.astype(jnp.float32) + 1e-40)
    return jax.nn.log_softmax(u, axis=-1)


if __name__ == "__main__":
    B, L, H = 2, 8, 32

    key = jax.random.PRNGKey(0)
    k1, k2, k3, k4, k5 = jax.random.split(key, 5)

    decoder_state = jax.random.normal(k1, (B, H), dtype=jnp.float32)
    encoder_outputs = jax.random.normal(k2, (B, L, H), dtype=jnp.float32)
    # mask with some zeroed positions (float 0/1, like PointerNet usage)
    mask = (jax.random.uniform(k3, (B, L)) > 0.25).astype(jnp.float32)
    mask = mask.at[:, 0].set(1.0)  # ensure at least one valid position per row

    # deterministic "Linear" weights (PyTorch layout: (out_features, in_features))
    w1 = jax.random.normal(k4, (H, H), dtype=jnp.float32) * (1.0 / jnp.sqrt(H))
    w2 = jax.random.normal(k5, (H, H), dtype=jnp.float32) * (1.0 / jnp.sqrt(H))
    vt = jax.random.normal(jax.random.fold_in(key, 7), (1, H), dtype=jnp.float32) * (
        1.0 / jnp.sqrt(H)
    )

    out = attention_forward(decoder_state, encoder_outputs, mask, w1, w2, vt)
    out = jax.block_until_ready(out)

    ref = attention_reference(decoder_state, encoder_outputs, mask, w1, w2, vt)
    assert out.shape == (B, L)
    # bf16 matmul operands (and bf16 tanh on v6e/v7x) vs the f32 reference.
    assert jnp.allclose(out, ref, atol=7e-2, rtol=7e-2), "mismatch vs reference"

    print("KERNEL_OK")
</pallas_src>

<mosaic_0001>
module attributes {stable_mosaic.version = 11 : i64} {
  func.func @attention_kernel(%arg0: i32, %arg1: memref<2x1x32xf32, #tpu.memory_space<vmem>>, %arg2: memref<16x32xf32, #tpu.memory_space<vmem>>, %arg3: memref<2x128xf32, #tpu.memory_space<vmem>>, %arg4: memref<32x32xbf16, #tpu.memory_space<vmem>>, %arg5: memref<1x1x32xf32, #tpu.memory_space<vmem>>, %arg6: memref<2x128xf32, #tpu.memory_space<vmem>>) attributes {dimension_semantics = [#tpu.dimension_semantics<parallel>], iteration_bounds = array<i64: 1>, scalar_prefetch = 0 : i64, scratch_operands = 0 : i64, tpu.core_type = #tpu.core_type<tc>, window_params = [{transform_indices = @transform_0, window_bounds = array<i64: 2, 1, 32>}, {transform_indices = @transform_1, window_bounds = array<i64: 16, 32>}, {transform_indices = @transform_2, window_bounds = array<i64: 2, 128>}, {pipeline_mode = #tpu.pipeline_mode<synchronous>, transform_indices = @transform_3, window_bounds = array<i64: 32, 32>}, {pipeline_mode = #tpu.pipeline_mode<synchronous>, transform_indices = @transform_4, window_bounds = array<i64: 1, 1, 32>}, {transform_indices = @transform_5, window_bounds = array<i64: 2, 128>}]} {
    %c0 = arith.constant 0 : index
    %c0_0 = arith.constant 0 : index
    %0 = vector.load %arg2[%c0, %c0_0] : memref<16x32xf32, #tpu.memory_space<vmem>>, vector<16x32xf32>
    %1 = arith.truncf %0 : vector<16x32xf32> to vector<16x32xbf16>
    %c0_1 = arith.constant 0 : index
    %c0_2 = arith.constant 0 : index
    %2 = vector.load %arg4[%c0_1, %c0_2] : memref<32x32xbf16, #tpu.memory_space<vmem>>, vector<32x32xbf16>
    %cst = arith.constant dense<0.000000e+00> : vector<16x32xf32>
    %3 = tpu.matmul %1, %2, %cst {dimension_numbers = #tpu.dot_dimension_numbers<[1], [0], [0], [1], [0, 0, 1, 1], [], []>} : vector<16x32xbf16>, vector<32x32xbf16>, vector<16x32xf32> -> vector<16x32xf32>
    %4 = vector.shape_cast %3 : vector<16x32xf32> to vector<2x8x32xf32>
    %c0_3 = arith.constant 0 : index
    %c0_4 = arith.constant 0 : index
    %c0_5 = arith.constant 0 : index
    %5 = vector.load %arg1[%c0_3, %c0_4, %c0_5] : memref<2x1x32xf32, #tpu.memory_space<vmem>>, vector<2x1x32xf32>
    %6 = vector.broadcast %5 : vector<2x1x32xf32> to vector<2x8x32xf32>
    %7 = arith.addf %4, %6 : vector<2x8x32xf32>
    %8 = math.tanh %7 : vector<2x8x32xf32>
    %c0_6 = arith.constant 0 : index
    %c0_7 = arith.constant 0 : index
    %c0_8 = arith.constant 0 : index
    %9 = vector.load %arg5[%c0_6, %c0_7, %c0_8] : memref<1x1x32xf32, #tpu.memory_space<vmem>>, vector<1x1x32xf32>
    %10 = vector.broadcast %9 : vector<1x1x32xf32> to vector<2x8x32xf32>
    %11 = arith.mulf %8, %10 : vector<2x8x32xf32>
    %cst_9 = arith.constant dense<0.000000e+00> : vector<2x8xf32>
    %12 = vector.multi_reduction <add>, %11, %cst_9 [2] : vector<2x8x32xf32> to vector<2x8xf32>
    %c0_10 = arith.constant 0 : index
    %c0_11 = arith.constant 0 : index
    %13 = vector.load %arg3[%c0_10, %c0_11] : memref<2x128xf32, #tpu.memory_space<vmem>>, vector<2x128xf32>
    %c0_12 = arith.constant 0 : index
    %c0_13 = arith.constant 0 : index
    %14 = vector.load %arg6[%c0_12, %c0_13] : memref<2x128xf32, #tpu.memory_space<vmem>>, vector<2x128xf32>
    tpu.vector_store %arg6[%c0_12, %c0_13], %13 {strides = array<i32>} : memref<2x128xf32, #tpu.memory_space<vmem>>, vector<2x128xf32>,
    %c0_14 = arith.constant 0 : index
    %c0_15 = arith.constant 0 : index
    %15 = vector.load %arg3[%c0_14, %c0_15] : memref<2x128xf32, #tpu.memory_space<vmem>>, vector<2x8xf32>
    %16 = arith.addf %15, %12 : vector<2x8xf32>
    %c0_16 = arith.constant 0 : index
    %c0_17 = arith.constant 0 : index
    %17 = vector.load %arg6[%c0_16, %c0_17] : memref<2x128xf32, #tpu.memory_space<vmem>>, vector<2x8xf32>
    tpu.vector_store %arg6[%c0_16, %c0_17], %16 {strides = array<i32>} : memref<2x128xf32, #tpu.memory_space<vmem>>, vector<2x8xf32>,
    %c0_18 = arith.constant 0 : index
    %c0_19 = arith.constant 0 : index
    %18 = vector.load %arg6[%c0_18, %c0_19] : memref<2x128xf32, #tpu.memory_space<vmem>>, vector<2x128xf32>
    %cst_20 = arith.constant dense<0xFF800000> : vector<2xf32>
    %19 = vector.multi_reduction <maximumf>, %18, %cst_20 [1] : vector<2x128xf32> to vector<2xf32>
    %20 = vector.shape_cast %19 : vector<2xf32> to vector<2x1xf32>
    %21 = vector.broadcast %20 : vector<2x1xf32> to vector<2x128xf32>
    %22 = arith.subf %18, %21 : vector<2x128xf32>
    %23 = math.exp %22 : vector<2x128xf32>
    %cst_21 = arith.constant dense<0.000000e+00> : vector<2xf32>
    %24 = vector.multi_reduction <add>, %23, %cst_21 [1] : vector<2x128xf32> to vector<2xf32>
    %25 = vector.shape_cast %24 : vector<2xf32> to vector<2x1xf32>
    %26 = math.log %25 : vector<2x1xf32>
    %27 = vector.broadcast %26 : vector<2x1xf32> to vector<2x128xf32>
    %28 = arith.subf %22, %27 : vector<2x128xf32>
    %c0_22 = arith.constant 0 : index
    %c0_23 = arith.constant 0 : index
    %29 = vector.load %arg6[%c0_22, %c0_23] : memref<2x128xf32, #tpu.memory_space<vmem>>, vector<2x128xf32>
    tpu.vector_store %arg6[%c0_22, %c0_23], %28 {strides = array<i32>} : memref<2x128xf32, #tpu.memory_space<vmem>>, vector<2x128xf32>,
    return
  }
  func.func @transform_0(%arg0: i32) -> (i32, i32, i32) {
    %c0_i32 = arith.constant 0 : i32
    %c0_i32_0 = arith.constant 0 : i32
    %c0_i32_1 = arith.constant 0 : i32
    return %arg0, %c0_i32, %c0_i32_0 : i32, i32, i32
  }
  func.func @transform_1(%arg0: i32) -> (i32, i32) {
    %c0_i32 = arith.constant 0 : i32
    %c0_i32_0 = arith.constant 0 : i32
    return %arg0, %c0_i32 : i32, i32
  }
  func.func @transform_2(%arg0: i32) -> (i32, i32) {
    %c0_i32 = arith.constant 0 : i32
    %c0_i32_0 = arith.constant 0 : i32
    return %arg0, %c0_i32 : i32, i32
  }
  func.func @transform_3(%arg0: i32) -> (i32, i32) {
    %c0_i32 = arith.constant 0 : i32
    %c0_i32_0 = arith.constant 0 : i32
    %c0_i32_1 = arith.constant 0 : i32
    return %c0_i32, %c0_i32_0 : i32, i32
  }
  func.func @transform_4(%arg0: i32) -> (i32, i32, i32) {
    %c0_i32 = arith.constant 0 : i32
    %c0_i32_0 = arith.constant 0 : i32
    %c0_i32_1 = arith.constant 0 : i32
    %c0_i32_2 = arith.constant 0 : i32
    return %c0_i32, %c0_i32_0, %c0_i32_1 : i32, i32, i32
  }
  func.func @transform_5(%arg0: i32) -> (i32, i32) {
    %c0_i32 = arith.constant 0 : i32
    %c0_i32_0 = arith.constant 0 : i32
    return %arg0, %c0_i32 : i32, i32
  }
}

</mosaic_0001>

<bundles_post_ra>
// kernel: tpu_custom_call.1
= control target key start
LH: loop header
LB: loop body
LE: loop exit
PB: predicated region body
PF: predicated region fallthrough
CT: control target
= control target key end

     0   :  { %10 = vsyncpa [#allocation3], 0  ;;  %s536_s0 = inlined_call_operand.hbm [shape: f32[2,1,32], index: 0, kind: input, shape index: {}]   ;;  %s537_s1 = inlined_call_operand.hbm [shape: f32[16,32], index: 1, kind: input, shape index: {}]   ;;  %s538_s2 = inlined_call_operand.hbm [shape: f32[2,128], index: 2, kind: input, shape index: {}]   ;;  %s539_s3 = inlined_call_operand.hbm [shape: bf16[32,32], index: 3, kind: input, shape index: {}]   ;;  %s540_s4 = inlined_call_operand.hbm [shape: f32[1,1,32], index: 4, kind: input, shape index: {}]   ;;  %s541_s5 = inlined_call_operand.hbm [shape: f32[2,128], index: 5, kind: output, shape index: {}]  }
   0x1   :  { %11 = vsyncpa [#allocation6], 0 }
   0x2   :  { %12 = vsyncpa [#allocation9], 0 }
   0x3   :  { %13 = vsyncpa [#allocation4], 0  ;;  %s417_s18 = smov [#allocation5]   ;;  %s277_s22 = scalar_lea.hbm %s537_s1, 256 }
   0x4   :  { %s31_s19 = sshll.u32 %s417_s18, 4  ;;  %p278_p0 = scmp.ne.s32.totalorder %s537_s1, %s277_s22  ;;  %s32_s19 = int_to_ptr.vmem [resolvable:$true] %s31_s19 }
   0x5   :  { %p281_p1 = scmp.lt.u32.totalorder %s277_s22, %s537_s1 }
   0x7   :  { %p283_p2 = pnand %p281_p1, %p278_p0 }
   0x9   :  { %286 = shalt.err (!%p283_p2)
}
   0xa   :  { %s287_s27 = scalar_lea.vmem %s32_s19, 256  ;;  %p292_p4 = scmp.lt.s32.totalorder %s32_s19, %s32_s19 }
   0xb   :  { %p288_p3 = scmp.ne.s32.totalorder %s32_s19, %s287_s27  ;;  %p293_p5 = scmp.lt.s32.totalorder %s287_s27, %s287_s27 }
   0xd   :  { %p294_p6 = por %p293_p5, %p292_p4 }
   0xf   :  { %p295_p7 = pnand %p294_p6, %p288_p3 }
  0x11   :  { %298 = shalt.err (!%p295_p7)
}
  0x12   :  { %s418_s28 = smov 128   ;;  %s419_s29 = smov 8  }
  0x13   :  { %37 = dma.hbm_to_vmem [thread:$0]  %s537_s1, 256, %s32_s19, [#allocation6], %s418_s28, %s418_s28, %s419_s29  }
  0x14   :  { %s420_s7 = smov [#allocation8]   ;;  %s299_s11 = scalar_lea.hbm %s539_s3, 256 }
  0x15   :  { %s53_s8 = sshll.u32 %s420_s7, 4  ;;  %p300_p8 = scmp.ne.s32.totalorder %s539_s3, %s299_s11  ;;  %s54_s8 = int_to_ptr.vmem [resolvable:$true] %s53_s8 }
  0x16   :  { %p303_p9 = scmp.lt.u32.totalorder %s299_s11, %s539_s3 }
  0x18   :  { %p305_p10 = pnand %p303_p9, %p300_p8 }
  0x1a   :  { %308 = shalt.err (!%p305_p10)
}
  0x1b   :  { %s309_s16 = scalar_lea.vmem %s54_s8, 256  ;;  %p314_p12 = scmp.lt.s32.totalorder %s54_s8, %s54_s8 }
  0x1c   :  { %p310_p11 = scmp.ne.s32.totalorder %s54_s8, %s309_s16  ;;  %p315_p13 = scmp.lt.s32.totalorder %s309_s16, %s309_s16 }
  0x1e   :  { %p316_p0 = por %p315_p13, %p314_p12 }
  0x20   :  { %p317_p1 = pnand %p316_p0, %p310_p11 }
  0x22   :  { %320 = shalt.err (!%p317_p1)
}
  0x23   :  { %s421_s1 = smov 64   ;;  %s422_s17 = smov 4  }
  0x24   :  { %59 = dma.hbm_to_vmem [thread:$0]  %s539_s3, 256, %s54_s8, [#allocation9], %s421_s1, %s421_s1, %s422_s17  }
  0x25   :  { %s423_s20 = smov [#allocation2]   ;;  %s321_s24 = scalar_lea.hbm %s536_s0, 32 }
  0x26   :  { %s19_s21 = sshll.u32 %s423_s20, 4  ;;  %p322_p2 = scmp.ne.s32.totalorder %s536_s0, %s321_s24  ;;  %s20_s21 = int_to_ptr.vmem [resolvable:$true] %s19_s21 }
  0x27   :  { %p325_p3 = scmp.lt.u32.totalorder %s321_s24, %s536_s0 }
  0x29   :  { %p327_p4 = pnand %p325_p3, %p322_p2 }
  0x2b   :  { %330 = shalt.err (!%p327_p4)
}
  0x2c   :  { %s331_s29 = scalar_lea.vmem %s20_s21, 32  ;;  %p336_p6 = scmp.lt.s32.totalorder %s20_s21, %s20_s21 }
  0x2d   :  { %p332_p5 = scmp.ne.s32.totalorder %s20_s21, %s331_s29  ;;  %p337_p7 = scmp.lt.s32.totalorder %s331_s29, %s331_s29 }
  0x2f   :  { %p338_p8 = por %p337_p7, %p336_p6 }
  0x31   :  { %p339_p9 = pnand %p338_p8, %p332_p5 }
  0x33   :  { %342 = shalt.err (!%p339_p9)
}
  0x34   :  { %s424_s3 = smov 16   ;;  %s425_s30 = smov 1  }
  0x35   :  { %25 = dma.hbm_to_vmem [thread:$0]  %s536_s0, 32, %s20_s21, [#allocation3], %s424_s3, %s424_s3, %s425_s30  }
  0x36   :  { %s426_s8 = smov [#allocation7]   ;;  %s427_s10 = smov [#allocation10]  }
  0x37   :  { %s44_s9 = sshll.u32 %s426_s8, 4  ;;  %s66_s11 = sshll.u32 %s427_s10, 4  ;;  %s45_s9 = int_to_ptr.vmem [resolvable:$true] %s44_s9  ;;  %s67_s11 = int_to_ptr.vmem [resolvable:$true] %s66_s11 }
  0x38   :  { %s343_s14 = scalar_lea.hbm %s538_s2, 32 }
  0x39   :  { %p344_p10 = scmp.ne.s32.totalorder %s538_s2, %s343_s14  ;;  %p347_p11 = scmp.lt.u32.totalorder %s343_s14, %s538_s2 }
  0x3b   :  { %p349_p12 = pnand %p347_p11, %p344_p10 }
  0x3d   :  { %352 = shalt.err (!%p349_p12)
}
  0x3e   :  { %s353_s0 = scalar_lea.vmem %s45_s9, 32  ;;  %p358_p0 = scmp.lt.s32.totalorder %s45_s9, %s45_s9 }
  0x3f   :  { %p354_p13 = scmp.ne.s32.totalorder %s45_s9, %s353_s0  ;;  %p359_p1 = scmp.lt.s32.totalorder %s353_s0, %s353_s0 }
  0x41   :  { %p360_p2 = por %p359_p1, %p358_p0 }
  0x43   :  { %p361_p3 = pnand %p360_p2, %p354_p13 }
  0x45   :  { %364 = shalt.err (!%p361_p3)
}
  0x46   :  { %47 = dma.hbm_to_vmem [thread:$0]  %s538_s2, 32, %s45_s9, [#allocation6]  }
  0x47   :  { %s365_s22 = scalar_lea.hbm %s540_s4, 16 }
  0x48   :  { %p366_p4 = scmp.ne.s32.totalorder %s540_s4, %s365_s22  ;;  %p369_p5 = scmp.lt.u32.totalorder %s365_s22, %s540_s4 }
  0x4a   :  { %p371_p6 = pnand %p369_p5, %p366_p4 }
  0x4c   :  { %374 = shalt.err (!%p371_p6)
}
  0x4d   :  { %s375_s27 = scalar_lea.vmem %s67_s11, 16  ;;  %s379_s28 = scalar_lea.vmem %s67_s11, 32 }
  0x4e   :  { %p376_p7 = scmp.ne.s32.totalorder %s67_s11, %s375_s27  ;;  %p380_p8 = scmp.lt.s32.totalorder %s67_s11, %s67_s11 }
  0x4f   :  { %p381_p9 = scmp.lt.s32.totalorder %s379_s28, %s375_s27 }
  0x51   :  { %p382_p10 = por %p381_p9, %p380_p8 }
  0x53   :  { %p383_p11 = pnand %p382_p10, %p376_p7 }
  0x55   :  { %386 = shalt.err (!%p383_p11)
}
  0x56   :  { %69 = dma.hbm_to_vmem [thread:$0]  %s540_s4, 16, %s67_s11, [#allocation9]  }
  0x57   :  { %409 = dma.done.wait [#allocation3], 32  }
  0x58   :  { %410 = vsyncadd [#allocation3], 4294967264 }
  0x59   :  { %411 = dma.done.wait [#allocation6], 288  }
  0x5a   :  { %412 = vsyncadd [#allocation6], 4294967008 }
  0x5b   :  { %413 = dma.done.wait [#allocation9], 272  }
  0x5c   :  { %414 = vsyncadd [#allocation9], 4294967024  ;;  %v428_v0 = vmov 0.0   ;;  %vm429_vm0 = vmmov 0   ;;  %v267_v1 = vld [vmem:[#allocation8] sm:$0xff]   ;;  %v268_v2 = vld [vmem:[#allocation8 + $0x8] sm:$0xff]   ;;  %v188_v22 = vlaneseq }
  0x5d   :  { %245 = vmatprep.subr.bf16.mxu0 %v428_v0  ;;  %249 = vmatprep.mubr.msk.bf16.mxu0 %vm429_vm0, %v428_v0  ;;  %v86_v3 = vld [vmem:[#allocation5] sm:$0xff]  ;;  %v87_v4 = vld [vmem:[#allocation5 + $0x8] sm:$0xff]  ;;  %vm105_vm1 = vcmask 261120   ;;  %v239_v6 = vld [vmem:[#allocation2] ss:$0 sm:$0xff]  ;;  %vm198_vm2 = vcmask 1041409  }
  0x5e   :  { %246 = vmatpush3.bf16.msra.mxu0 %v267_v1  ;;  %v88_v5 = vpack.c.bf16 %v87_v4, %v86_v3  ;;  %v240_v8 = vld [vmem:[#allocation2 + $0x1] ss:$0 sm:$0xff]  ;;  %v241_v14 = vld [vmem:[#allocation10] ss:$0 sm:$0xff]  ;;  %v183_v21 = vld [vmem:[#allocation7] sm:$0x3] }
  0x5f   :  { %247 = vmatprep.subr.bf16.mxu0 %v428_v0  ;;  %184 = vst [vmem:[#allocation11] sm:$0x3] %v183_v21  ;;  %v189_v23 = vand.u32 127, %v188_v22  ;;  %v191_v24 = vshrl.u32 %v188_v22, 7  ;;  %v185_v29 = vld [vmem:[#allocation7] sm:$0x3] }
  0x60   :  { %vm202_vm3 = vcmask 58368   ;;  %vm205_vm4 = vcmask 1041408   ;;  %s430_s4 = smov [#allocation11]  }
  0x61   :  { %v192_v26 = vsub.s32 %v189_v23, %v191_v24  ;;  %s225_s3 = sshll.u32 %s430_s4, 4  ;;  %s226_s3 = int_to_ptr.vmem [resolvable:$true] %s225_s3 }
  0x62   :  { %248 = vmatpush3.bf16.msra.mxu0 %v268_v2  ;;  %s387_s30 = scalar_lea.vmem %s226_s3, 32  ;;  %p392_p13 = scmp.lt.s32.totalorder %s226_s3, %s226_s3 }
  0x63   :  { %p388_p12 = scmp.ne.s32.totalorder %s226_s3, %s387_s30  ;;  %p393_p0 = scmp.lt.s32.totalorder %s387_s30, %s387_s30 }
  0x65   :  { %250 = vmatmul.mubr.msk.bf16.vlgmr.msra.gmra.mrb[0].mxu0 %vm105_vm1, %v88_v5  ;;  %p394_p1 = por %p393_p0, %p392_p13 }
  0x67   :  { %p395_p2 = pnand %p394_p1, %p388_p12 }
 0x138   :  { %v143_v7 = vpop.f32.mrb[0].mxu0 }
 0x139   :  { %v164_v9 = vadd.f32 %v239_v6, %v143_v7  ;;  %v251_v10 = vpop.f32.mrb[1].mxu0 }
 0x13a   :  { %v146_v11 = vpop.f32.mrb[2].mxu0 }
 0x13b   :  { %269 = vtanh.f32 %v164_v9  ;;  %v165_v12 = vadd.f32 %v240_v8, %v146_v11  ;;  %v252_v13 = vpop.f32.mrb[3].mxu0 }
 0x13d   :  { %271 = vtanh.f32 %v165_v12 }
 0x145   :  { %v270_v15 = vpop.eup %269 }
 0x146   :  { %v175_v16 = vmul.f32 %v270_v15, %v241_v14 }
 0x147   :  { %v272_v17 = vpop.eup %271 }
 0x148   :  { %v177_v18 = vsel %vm105_vm1, %v175_v16, 0.0  ;;  %v176_v19 = vmul.f32 %v272_v17, %v241_v14 }
 0x149   :  { %178 = vadd.xlane.f32.xlu0 %v177_v18 }
 0x14a   :  { %v180_v20 = vsel %vm105_vm1, %v176_v19, 0.0 }
 0x14d   :  { %181 = vadd.xlane.f32.xlu0 %v180_v20 }
 0x1d6   :  { %v179_v25 = vpop.xlane.xlu0 %178 }
 0x1d7   :  { %v193_v28 = vrot.slane %v179_v25, %v192_v26 }
 0x1da   :  { %v182_v27 = vpop.xlane.xlu0 %181 }
 0x1db   :  { %v197_v30 = vrot.slane %v182_v27, %v192_v26 }
 0x1dd   :  { %v199_v31 = vsel %vm198_vm2, %v197_v30, %v193_v28 }
 0x1de   :  { %v201_v32 = vadd.f32 %v199_v31, %v185_v29 }
 0x1e0   :  { %203 = vst.msk [vmem:[#allocation11] sm:$0x3] %vm202_vm3, %v201_v32 }
 0x1e7   :  { %v204_v33 = vld [vmem:[#allocation11] sm:$0x3] }
 0x1e8   :  { %v206_v34 = vsel %vm205_vm4, %v204_v33, -inf }
 0x1e9   :  { %207 = vmax.xlane.f32.xlu1 %v206_v34 }
 0x276   :  { %v208_v35 = vpop.xlane.xlu1 %207 }
 0x277   :  { %v209_v36 = vsub.f32 %v204_v33, %v208_v35 }
 0x279   :  { %v210_v37 = vmul.f32 1.442695, %v209_v36 }
 0x27b   :  { %273 = vpow2.f32 %v210_v37 }
 0x285   :  { %v274_v38 = vpop.eup %273 }
 0x286   :  { %v212_v39 = vsel %vm205_vm4, %v274_v38, 0.0 }
 0x287   :  { %213 = vadd.xlane.f32.xlu1 %v212_v39 }
 0x314   :  { %v214_v40 = vpop.xlane.xlu1 %213 }
 0x315   :  { %275 = vlog2.f32 %v214_v40 }
 0x31f   :  { %v276_v41 = vpop.eup %275 }
 0x320   :  { %v216_v42 = vmul.f32 0.6931472, %v276_v41 }
 0x322   :  { %v217_v43 = vsub.f32 %v209_v36, %v216_v42 }
 0x324   :  { %218 = vst [vmem:[#allocation11] sm:$0x3] %v217_v43 }
 0x325   :  { %398 = shalt.err (!%p395_p2)
}
 0x326   :  { %s399_s8 = scalar_lea.hbm %s541_s5, 32 }
 0x327   :  { %p400_p3 = scmp.ne.s32.totalorder %s541_s5, %s399_s8  ;;  %p403_p4 = scmp.lt.u32.totalorder %s399_s8, %s541_s5 }
 0x329   :  { %p405_p5 = pnand %p403_p4, %p400_p3 }
 0x32b   :  { %408 = shalt.err (!%p405_p5)
}
 0x32c   :  { %228 = dma.vmem_to_hbm [thread:$0]  %s226_s3, 32, %s541_s5, [#allocation4]  }
 0x32d   :  { %415 = dma.done.wait [#allocation4], 32  }
 0x32e   :  { %416 = vsyncadd [#allocation4], 4294967264 }
 0x32f   :  { %232 = vsyncpa [#allocation3], 1 }
 0x330   :  { %233 = vsyncpa [#allocation6], 1 }
 0x331   :  { %234 = vsyncpa [#allocation9], 1 }
 0x332   :  { %235 = vsyncpa [#allocation4], 1 }

</bundles_post_ra>
